<compile_context>
chip_gen: v5e
topology: v5e:2x2
jax: 0.10.0
libtpu: 0.0.40
codegen_flags: <defaults>
</compile_context>

<pallas_src>
import jax
import jax.numpy as jnp
from jax.experimental import pallas as pl
from jax.experimental.pallas import tpu as pltpu


def _mux_kernel(task_ref, x_ref, w_ref, b_ref, o_ref, acc_ref):
    # x_ref: (tm, tk) bf16, w_ref: (tk, tn) bf16 (task-selected slab),
    # b_ref: (1, tn) f32, o_ref: (tm, tn) f32, acc_ref: (tm, tn) f32 scratch.
    del task_ref  # consumed by the index_maps (scalar prefetch), not the body
    k = pl.program_id(2)

    @pl.when(k == 0)
    def _():
        # Fold the bias into the accumulator init (added exactly once).
        acc_ref[...] = jnp.broadcast_to(b_ref[...], acc_ref.shape)

    acc_ref[...] += jnp.dot(
        x_ref[...], w_ref[...], preferred_element_type=jnp.float32
    )

    @pl.when(k == pl.num_programs(2) - 1)
    def _():
        o_ref[...] = acc_ref[...].astype(o_ref.dtype)


def _round_up(x, m):
    return ((x + m - 1) // m) * m


def _pick_tile(dim, candidates=(512, 256, 128)):
    # Largest lane-dense tile that does not over-pad a small dim.
    for c in candidates:
        if dim >= c:
            return c
    return 128


def multiplexer_forward(x, stacked_w, stacked_b, task):
    """Apply the `task`-th linear head to the whole batch.

    x:         (B, H) float32
    stacked_w: (T, H, D) float32   -- one weight matrix per task
    stacked_b: (T, 1, D) float32   -- one bias per task
    task:      scalar int          -- which sub-module to multiplex to
    """
    B, H = x.shape
    T, Hw, D = stacked_w.shape
    assert H == Hw

    # ---- tile sizes: lane-dense (multiples of 128) last dims ----------------
    tk = _pick_tile(H)                     # contraction tile
    tn = _pick_tile(D)                     # output-lane tile
    B8 = _round_up(B, 8)
    tm = 128 if B8 >= 128 else B8          # batch (sublane) tile

    H_pad = _round_up(H, tk)
    D_pad = _round_up(D, tn)
    B_pad = _round_up(B, tm)

    # ---- pad + cast matmul operands to bf16 (f32 accumulation in-kernel) ----
    x_p = jnp.pad(x.astype(jnp.bfloat16), ((0, B_pad - B), (0, H_pad - H)))
    w_p = jnp.pad(stacked_w.astype(jnp.bfloat16),
                  ((0, 0), (0, H_pad - H), (0, D_pad - D)))
    b_p = jnp.pad(stacked_b.astype(jnp.float32),
                  ((0, 0), (0, 0), (0, D_pad - D)))

    # Clamp the task id so a bad id can never drive an OOB weight-slab DMA.
    task_arr = jnp.clip(jnp.asarray(task, dtype=jnp.int32), 0, T - 1).reshape((1,))

    grid = (B_pad // tm, D_pad // tn, H_pad // tk)

    grid_spec = pltpu.PrefetchScalarGridSpec(
        num_scalar_prefetch=1,              # task id lands in SMEM, feeds index_maps
        grid=grid,
        in_specs=[
            # activations: (tm, tk) tile
            pl.BlockSpec((tm, tk), lambda i, j, k, t: (i, k)),
            # task-selected weight tile: T block index comes from SMEM
            pl.BlockSpec((pl.Squeezed(), tk, tn), lambda i, j, k, t: (t[0], k, j)),
            # task-selected bias tile
            pl.BlockSpec((pl.Squeezed(), 1, tn), lambda i, j, k, t: (t[0], 0, j)),
        ],
        out_specs=pl.BlockSpec((tm, tn), lambda i, j, k, t: (i, j)),
        scratch_shapes=[pltpu.VMEM((tm, tn), jnp.float32)],
    )

    out = pl.pallas_call(
        _mux_kernel,
        out_shape=jax.ShapeDtypeStruct((B_pad, D_pad), jnp.float32),
        grid_spec=grid_spec,
        compiler_params=pltpu.CompilerParams(
            dimension_semantics=("parallel", "parallel", "arbitrary"),
            vmem_limit_bytes=32 * 1024 * 1024),
    )(task_arr, x_p, w_p, b_p)

    return out[:B, :D]


def _reference(x, stacked_w, stacked_b, task):
    # Same math / same bf16-input + f32-accumulation numerics as the kernel.
    xw = jnp.dot(x.astype(jnp.bfloat16),
                 stacked_w[task].astype(jnp.bfloat16),
                 preferred_element_type=jnp.float32)
    return xw + stacked_b[task].astype(jnp.float32)


def _run_case(key, B, H, D, T, task):
    k_x, k_w, k_b = jax.random.split(key, 3)
    x = jax.random.normal(k_x, (B, H), dtype=jnp.float32)
    stacked_w = jax.random.normal(k_w, (T, H, D), dtype=jnp.float32) * 0.05
    stacked_b = jax.random.normal(k_b, (T, 1, D), dtype=jnp.float32) * 0.05

    out = multiplexer_forward(x, stacked_w, stacked_b, task)
    out = jax.block_until_ready(out)

    ref = _reference(x, stacked_w, stacked_b, task)
    assert out.shape == (B, D)
    assert jnp.allclose(out, ref, atol=1e-3, rtol=1e-2), (
        float(jnp.max(jnp.abs(out - ref))))


if __name__ == "__main__":
    key = jax.random.PRNGKey(0)
    k0, k1, k2 = jax.random.split(key, 3)

    # Toy shapes from the module (single grid step after padding).
    _run_case(k0, B=8, H=32, D=16, T=3, task=1)

    # Larger case that exercises the K / N grid tiling + accumulator.
    _run_case(k1, B=16, H=320, D=200, T=4, task=2)

    # Case large enough to trigger the 512-wide K/N tiles.
    _run_case(k2, B=64, H=640, D=512, T=5, task=0)

    print("KERNEL_OK")
</pallas_src>

<mosaic_0001>
module attributes {stable_mosaic.version = 11 : i64} {
  func.func @_mux_kernel(%arg0: i32, %arg1: i32, %arg2: i32, %arg3: memref<1xi32, #tpu.memory_space<smem>>, %arg4: memref<8x128xbf16, #tpu.memory_space<vmem>>, %arg5: memref<1x128x128xbf16, #tpu.memory_space<vmem>>, %arg6: memref<1x1x128xf32, #tpu.memory_space<vmem>>, %arg7: memref<8x128xf32, #tpu.memory_space<vmem>>, %arg8: memref<8x128xf32, #tpu.memory_space<vmem>>) attributes {dimension_semantics = [#tpu.dimension_semantics<parallel>, #tpu.dimension_semantics<parallel>, #tpu.dimension_semantics<arbitrary>], iteration_bounds = array<i64: 1, 1, 1>, scalar_prefetch = 1 : i64, scratch_operands = 1 : i64, tpu.core_type = #tpu.core_type<tc>, window_params = [{transform_indices = @transform_0, window_bounds = array<i64: 8, 128>}, {transform_indices = @transform_1, window_bounds = array<i64: 1, 128, 128>}, {transform_indices = @transform_2, window_bounds = array<i64: 1, 1, 128>}, {transform_indices = @transform_3, window_bounds = array<i64: 8, 128>}]} {
    %c0_i32 = arith.constant 0 : i32
    %0 = arith.cmpi eq, %arg2, %c0_i32 : i32
    %1 = arith.extui %0 : i1 to i32
    %c0_i32_0 = arith.constant 0 : i32
    %2 = arith.cmpi ne, %1, %c0_i32_0 : i32
    scf.if %2 {
      %c0_11 = arith.constant 0 : index
      %c0_12 = arith.constant 0 : index
      %c0_13 = arith.constant 0 : index
      %13 = vector.load %arg6[%c0_11, %c0_12, %c0_13] : memref<1x1x128xf32, #tpu.memory_space<vmem>>, vector<1x1x128xf32>
      %14 = vector.shape_cast %13 : vector<1x1x128xf32> to vector<1x128xf32>
      %15 = vector.shape_cast %14 : vector<1x128xf32> to vector<1x128xf32>
      %16 = vector.broadcast %15 : vector<1x128xf32> to vector<8x128xf32>
      %c0_14 = arith.constant 0 : index
      %c0_15 = arith.constant 0 : index
      %17 = vector.load %arg8[%c0_14, %c0_15] : memref<8x128xf32, #tpu.memory_space<vmem>>, vector<8x128xf32>
      tpu.vector_store %arg8[%c0_14, %c0_15], %16 {strides = array<i32>} : memref<8x128xf32, #tpu.memory_space<vmem>>, vector<8x128xf32>,
    } else {
    }
    %c0 = arith.constant 0 : index
    %c0_1 = arith.constant 0 : index
    %3 = vector.load %arg8[%c0, %c0_1] : memref<8x128xf32, #tpu.memory_space<vmem>>, vector<8x128xf32>
    %c0_2 = arith.constant 0 : index
    %c0_3 = arith.constant 0 : index
    %4 = vector.load %arg4[%c0_2, %c0_3] : memref<8x128xbf16, #tpu.memory_space<vmem>>, vector<8x128xbf16>
    %c0_4 = arith.constant 0 : index
    %c0_5 = arith.constant 0 : index
    %c0_6 = arith.constant 0 : index
    %5 = vector.load %arg5[%c0_4, %c0_5, %c0_6] : memref<1x128x128xbf16, #tpu.memory_space<vmem>>, vector<1x128x128xbf16>
    %6 = vector.shape_cast %5 : vector<1x128x128xbf16> to vector<128x128xbf16>
    %cst = arith.constant dense<0.000000e+00> : vector<8x128xf32>
    %7 = tpu.matmul %4, %6, %cst {dimension_numbers = #tpu.dot_dimension_numbers<[1], [0], [0], [1], [0, 0, 1, 1], [], []>} : vector<8x128xbf16>, vector<128x128xbf16>, vector<8x128xf32> -> vector<8x128xf32>
    %8 = arith.addf %3, %7 : vector<8x128xf32>
    %c0_7 = arith.constant 0 : index
    %c0_8 = arith.constant 0 : index
    %9 = vector.load %arg8[%c0_7, %c0_8] : memref<8x128xf32, #tpu.memory_space<vmem>>, vector<8x128xf32>
    tpu.vector_store %arg8[%c0_7, %c0_8], %8 {strides = array<i32>} : memref<8x128xf32, #tpu.memory_space<vmem>>, vector<8x128xf32>,
    %c0_i32_9 = arith.constant 0 : i32
    %10 = arith.cmpi eq, %arg2, %c0_i32_9 : i32
    %11 = arith.extui %10 : i1 to i32
    %c0_i32_10 = arith.constant 0 : i32
    %12 = arith.cmpi ne, %11, %c0_i32_10 : i32
    scf.if %12 {
      %c0_11 = arith.constant 0 : index
      %c0_12 = arith.constant 0 : index
      %13 = vector.load %arg8[%c0_11, %c0_12] : memref<8x128xf32, #tpu.memory_space<vmem>>, vector<8x128xf32>
      %c0_13 = arith.constant 0 : index
      %c0_14 = arith.constant 0 : index
      %14 = vector.load %arg7[%c0_13, %c0_14] : memref<8x128xf32, #tpu.memory_space<vmem>>, vector<8x128xf32>
      tpu.vector_store %arg7[%c0_13, %c0_14], %13 {strides = array<i32>} : memref<8x128xf32, #tpu.memory_space<vmem>>, vector<8x128xf32>,
    } else {
    }
    return
  }
  func.func @transform_0(%arg0: i32, %arg1: i32, %arg2: i32, %arg3: memref<1xi32, #tpu.memory_space<smem>>) -> (i32, i32) {
    %c0_i32 = arith.constant 0 : i32
    return %arg0, %arg2 : i32, i32
  }
  func.func @transform_1(%arg0: i32, %arg1: i32, %arg2: i32, %arg3: memref<1xi32, #tpu.memory_space<smem>>) -> (i32, i32, i32) {
    %c0 = arith.constant 0 : index
    %0 = memref.load %arg3[%c0] : memref<1xi32, #tpu.memory_space<smem>>
    %c0_i32 = arith.constant 0 : i32
    return %0, %arg2, %arg1 : i32, i32, i32
  }
  func.func @transform_2(%arg0: i32, %arg1: i32, %arg2: i32, %arg3: memref<1xi32, #tpu.memory_space<smem>>) -> (i32, i32, i32) {
    %c0 = arith.constant 0 : index
    %0 = memref.load %arg3[%c0] : memref<1xi32, #tpu.memory_space<smem>>
    %c0_i32 = arith.constant 0 : i32
    %c0_i32_0 = arith.constant 0 : i32
    return %0, %c0_i32, %arg1 : i32, i32, i32
  }
  func.func @transform_3(%arg0: i32, %arg1: i32, %arg2: i32, %arg3: memref<1xi32, #tpu.memory_space<smem>>) -> (i32, i32) {
    %c0_i32 = arith.constant 0 : i32
    return %arg0, %arg1 : i32, i32
  }
}

</mosaic_0001>

<bundles_post_ra>
// kernel: tpu_custom_call.1
= control target key start
LH: loop header
LB: loop body
LE: loop exit
PB: predicated region body
PF: predicated region fallthrough
CT: control target
= control target key end

     0   :  { %10 = vsyncpa [#allocation6], 0  ;;  %s368_s0 = inlined_call_operand.<no memory space> [shape: s32[1], index: 0, kind: input, shape index: {}]   ;;  %s369_s1 = inlined_call_operand.hbm [shape: bf16[8,128], index: 1, kind: input, shape index: {}]   ;;  %s370_s2 = inlined_call_operand.hbm [shape: bf16[3,128,128], index: 2, kind: input, shape index: {}]   ;;  %s371_s3 = inlined_call_operand.vmem [shape: f32[3,1,128], index: 3, kind: input, shape index: {}]   ;;  %s372_s4 = inlined_call_operand.hbm [shape: f32[8,128], index: 4, kind: output, shape index: {}]  }
   0x1   :  { %11 = vsyncpa [#allocation9], 0 }
   0x2   :  { %12 = vsyncpa [#allocation7], 0  ;;  %s18_s17 = sshll.u32 %s369_s1, 4  ;;  %s311_s18 = smov [#allocation5]   ;;  %s19_s17 = int_to_ptr.hbm [resolvable:$true] %s18_s17 }
   0x3   :  { %s20_s19 = sshll.u32 %s311_s18, 4  ;;  %s218_s22 = sshll.u32 %s368_s0, 6  ;;  %s21_s19 = int_to_ptr.vmem [resolvable:$true] %s20_s19 }
   0x4   :  { %23 = dma.hbm_to_vmem [thread:$0]  %s19_s17, 64, %s21_s19, [#allocation6]  }
   0x5   :  { %s31_s25 = scalar_lea.hbm %s370_s2, %s218_s22  ;;  %s312_s27 = smov [#allocation8]  }
   0x6   :  { %s32_s26 = sshll.u32 %s31_s25, 4  ;;  %s34_s28 = sshll.u32 %s312_s27, 4  ;;  %s33_s26 = int_to_ptr.hbm [resolvable:$true] %s32_s26  ;;  %s35_s28 = int_to_ptr.vmem [resolvable:$true] %s34_s28 }
   0x7   :  { %s257_s29 = sshra.s32 %s33_s26, 4  ;;  %s261_s6 = scalar_lea.hbm %s370_s2, 192  ;;  %s258_s29 = int_to_ptr.hbm [resolvable:$true] %s257_s29 }
   0x8   :  { %s259_s1 = scalar_lea.hbm %s258_s29, 64  ;;  %p262_p1 = scmp.lt.s32.totalorder %s258_s29, %s370_s2 }
   0x9   :  { %p260_p0 = scmp.ne.s32.totalorder %s258_s29, %s259_s1  ;;  %p263_p2 = scmp.lt.s32.totalorder %s261_s6, %s259_s1 }
   0xb   :  { %p264_p3 = por %p263_p2, %p262_p1 }
   0xd   :  { %p265_p4 = pnand %p264_p3, %p260_p0 }
   0xf   :  { %268 = shalt.err (!%p265_p4)
}
  0x10   :  { %s313_s9 = smov 64   ;;  %s314_s10 = smov 4  }
  0x11   :  { %40 = dma.hbm_to_vmem [thread:$0]  %s33_s26, 1024, %s35_s28, [#allocation9], %s313_s9, %s313_s9, %s314_s10  }
  0x12   :  { %305 = dma.done.wait [#allocation6], 64  }
  0x13   :  { %306 = vsyncadd [#allocation6], 4294967232 }
  0x14   :  { %307 = dma.done.wait [#allocation9], 1024  }
  0x15   :  { %308 = vsyncadd [#allocation9], 4294966272  ;;  %p62_p5 = scmp.lt.s32.totalorder %s368_s0, 2  ;;  %v226_v0 = vld [vmem:[#allocation8 + $0x38] sm:$0xff]  ;;  %v225_v1 = vld [vmem:[#allocation8 + $0x30] sm:$0xff]  ;;  %s315_s17 = smov [#allocation10]  }
  0x16   :  { %141 = vmatpush.bf16.msra.mxu0 %v226_v0  ;;  %v224_v2 = vld [vmem:[#allocation8 + $0x28] sm:$0xff]  ;;  %v223_v3 = vld [vmem:[#allocation8 + $0x20] sm:$0xff]  ;;  %v222_v4 = vld [vmem:[#allocation8 + $0x18] sm:$0xff]  ;;  %s166_s18 = sshll.u32 %s315_s17, 4  ;;  %s167_s18 = int_to_ptr.vmem [resolvable:$true] %s166_s18 }
  0x17   :  { %s374_s0 = smov (!%p62_p5, %s368_s0), 2  ;;  %v221_v5 = vld [vmem:[#allocation8 + $0x10] sm:$0xff]  ;;  %v220_v6 = vld [vmem:[#allocation8 + $0x8] sm:$0xff]  ;;  %v219_v7 = vld [vmem:[#allocation8] sm:$0xff] }
  0x18   :  { %s64_s16 = scalar_lea.vmem %s371_s3, %s374_s0  ;;  %v76_v8 = vld [vmem:[#allocation5] sm:$0xf]  ;;  %s168_s3 = sshll.u32 %s372_s4, 4  ;;  %s169_s3 = int_to_ptr.hbm [resolvable:$true] %s168_s3 }
  0x19   :  { %v232_v9 = vld [vmem:[%s64_s16] ss:$0 sm:$0xff] }
  0x1a   :  { %142 = vmatpush.bf16.msra.mxu0 %v225_v1 }
  0x1e   :  { %143 = vmatpush.bf16.msra.mxu0 %v224_v2 }
  0x22   :  { %144 = vmatpush.bf16.msra.mxu0 %v223_v3 }
  0x26   :  { %145 = vmatpush.bf16.msra.mxu0 %v222_v4 }
  0x2a   :  { %146 = vmatpush.bf16.msra.mxu0 %v221_v5 }
  0x2e   :  { %147 = vmatpush.bf16.msra.mxu0 %v220_v6 }
  0x32   :  { %148 = vmatpush.bf16.msra.mxu0 %v219_v7 }
  0x35   :  { %149 = vmatmul.bf16.vlgmr.msra.gmra.mxu0 %v76_v8 }
  0xb2   :  { %v150_v10 = vpop.f32.mrf.mxu0 }
  0xb3   :  { %v154_v11 = vadd.f32 %v232_v9, %v150_v10 }
  0xb5   :  { %160 = vst [vmem:[#allocation10] sm:$0xff] %v154_v11 }
  0xb6   :  { %171 = dma.vmem_to_hbm [thread:$0]  %s167_s18, 128, %s169_s3, [#allocation7]  }
  0xba   :  { %v152_v12 = vpop.f32.mrf.mxu0 }
  0xbb   :  { %309 = dma.done.wait [#allocation7], 128  }
  0xbc   :  { %310 = vsyncadd [#allocation7], 4294967168 }
  0xbd   :  { %176 = vsyncpa [#allocation6], 1 }
  0xbe   :  { %177 = vsyncpa [#allocation9], 1 }
  0xbf   :  { %178 = vsyncpa [#allocation7], 1 }

</bundles_post_ra>
